<compile_context>
chip_gen: v7x
topology: tpu7x:2x2x1
jax: 0.10.0
libtpu: 0.0.40
codegen_flags: <defaults>
</compile_context>

<pallas_src>
import functools

import jax
import jax.numpy as jnp
from jax import lax
from jax.experimental import pallas as pl
from jax.experimental.pallas import tpu as pltpu

MIN_VAL = 1.0
MAX_VAL = 3.0

N, C, H, W = 6, 3, 28, 28
OUT_C, KH, KW = 64, 5, 5
STRIDE, PAD = 3, 1
OH = (H + 2 * PAD - KH) // STRIDE + 1   # 9
OW = (W + 2 * PAD - KW) // STRIDE + 1   # 9

M_VALID = N * OH * OW                   # 486 output positions
K_VALID = C * KH * KW                   # 75  contraction size
M_PAD = 512                             # sublane-aligned row count
K_PAD = 128                             # lane-dense contraction dim
N_PAD = 128                             # lane-dense output channels


# ------------------------------ Pallas kernel -------------------------------

def _fused_kernel(p_ref, w_ref, b_ref, o_ref, *, min_val, max_val, valid_rows):
    # (512, 128) @ (128, 128) on the MXU with f32 accumulation.
    acc = jnp.dot(p_ref[...], w_ref[...], preferred_element_type=jnp.float32)
    acc = acc + b_ref[...]                         # bias (1, 128) broadcast
    v3 = jnp.minimum(acc, max_val)                 # clamp_max

    # Padded columns (>=64) are exactly zero (zero weights + zero bias) and
    # stay zero through clamp_max; padded rows (>=486) picked up the bias, so
    # mask them out before the global sum.
    row_ids = lax.broadcasted_iota(jnp.int32, v3.shape, 0)
    v3 = jnp.where(row_ids < valid_rows, v3, 0.0)

    # Lane-reduce (keepdims) then sublane-reduce instead of one big XLU reduce.
    row_sums = jnp.sum(v3, axis=-1, keepdims=True)   # (512, 1)
    s = jnp.sum(row_sums)
    o_ref[0, 0] = jnp.clip(s, min_val, max_val)      # final clamp -> scalar


def fused_conv_clamp_sum(patches, w2, b2):
    return pl.pallas_call(
        functools.partial(_fused_kernel, min_val=MIN_VAL, max_val=MAX_VAL,
                          valid_rows=M_VALID),
        out_shape=jax.ShapeDtypeStruct((1, 1), jnp.float32),
        in_specs=[
            pl.BlockSpec(memory_space=pltpu.MemorySpace.VMEM),
            pl.BlockSpec(memory_space=pltpu.MemorySpace.VMEM),
            pl.BlockSpec(memory_space=pltpu.MemorySpace.VMEM),
        ],
        out_specs=pl.BlockSpec(memory_space=pltpu.MemorySpace.SMEM),
    )(patches, w2, b2)


# ------------------------------- glue (JAX) ---------------------------------

def prepare_params(weight, bias):
    """Hoisted (called once): reshape + pad the conv params to (128, 128)."""
    w2 = weight.reshape(OUT_C, K_VALID).T                          # (75, 64)
    w2 = jnp.pad(w2, ((0, K_PAD - K_VALID), (0, N_PAD - OUT_C)))   # (128, 128)
    b2 = jnp.pad(bias, (0, N_PAD - OUT_C)).reshape(1, N_PAD)       # (1, 128)
    return w2, b2


@jax.jit
def model_forward(x, w2, b2):
    # clamp_min BEFORE zero-padding (torch semantics); XLA fuses it with the
    # patch extraction below.
    v1 = jnp.maximum(x, MIN_VAL)
    # Single-op im2col: identity-kernel conv.  Channel-major ordering matches
    # torch's weight.reshape(OUT_C, C*KH*KW):
    #   patches[n, c*KH*KW + kh*KW + kw, oh, ow] = v1_pad[n, c, oh*S+kh, ow*S+kw]
    patches = lax.conv_general_dilated_patches(
        v1, (KH, KW), (STRIDE, STRIDE), ((PAD, PAD), (PAD, PAD)))  # (6,75,9,9)
    patches = jnp.transpose(patches, (0, 2, 3, 1)).reshape(M_VALID, K_VALID)
    patches = jnp.pad(patches,
                      ((0, M_PAD - M_VALID), (0, K_PAD - K_VALID)))  # (512,128)
    out = fused_conv_clamp_sum(patches, w2, b2)
    return out[0, 0]


@jax.jit
def reference_forward(x, weight, bias):
    v1 = jnp.maximum(x, MIN_VAL)
    v2 = lax.conv_general_dilated(
        v1, weight, window_strides=(STRIDE, STRIDE),
        padding=((PAD, PAD), (PAD, PAD)),
        dimension_numbers=("NCHW", "OIHW", "NCHW"))
    v2 = v2 + bias[None, :, None, None]
    v3 = jnp.minimum(v2, MAX_VAL)
    return jnp.clip(jnp.sum(v3), MIN_VAL, MAX_VAL)


# ---------------------------------- main -------------------------------------

if __name__ == "__main__":
    key = jax.random.PRNGKey(0)
    kx, kw, kb = jax.random.split(key, 3)

    x = jax.random.normal(kx, (N, C, H, W), dtype=jnp.float32)

    # deterministic Conv2d-style init: U(-1/sqrt(fan_in), 1/sqrt(fan_in))
    fan_in = C * KH * KW
    bound = 1.0 / (fan_in ** 0.5)
    weight = jax.random.uniform(kw, (OUT_C, C, KH, KW), jnp.float32,
                                minval=-bound, maxval=bound)
    bias = jax.random.uniform(kb, (OUT_C,), jnp.float32,
                              minval=-bound, maxval=bound)

    w2, b2 = prepare_params(weight, bias)   # hoisted out of the jitted forward

    out = jax.block_until_ready(model_forward(x, w2, b2))
    ref = jax.block_until_ready(reference_forward(x, weight, bias))

    assert jnp.allclose(out, ref, atol=1e-3, rtol=1e-4), (out, ref)
    print("KERNEL_OK")
</pallas_src>

<mosaic_0001>
module attributes {stable_mosaic.version = 11 : i64} {
  func.func @_fused_kernel(%arg0: memref<512x128xf32, #tpu.memory_space<vmem>>, %arg1: memref<128x128xf32, #tpu.memory_space<vmem>>, %arg2: memref<1x128xf32, #tpu.memory_space<vmem>>, %arg3: memref<1x1xf32, #tpu.memory_space<smem>>) attributes {dimension_semantics = [], scalar_prefetch = 0 : i64, scratch_operands = 0 : i64, tpu.core_type = #tpu.core_type<tc>} {
    %c0 = arith.constant 0 : index
    %c0_0 = arith.constant 0 : index
    %0 = vector.load %arg0[%c0, %c0_0] : memref<512x128xf32, #tpu.memory_space<vmem>>, vector<512x128xf32>
    %c0_1 = arith.constant 0 : index
    %c0_2 = arith.constant 0 : index
    %1 = vector.load %arg1[%c0_1, %c0_2] : memref<128x128xf32, #tpu.memory_space<vmem>>, vector<128x128xf32>
    %cst = arith.constant dense<0.000000e+00> : vector<512x128xf32>
    %2 = tpu.matmul %0, %1, %cst {dimension_numbers = #tpu.dot_dimension_numbers<[1], [0], [0], [1], [0, 0, 1, 1], [], []>} : vector<512x128xf32>, vector<128x128xf32>, vector<512x128xf32> -> vector<512x128xf32>
    %c0_3 = arith.constant 0 : index
    %c0_4 = arith.constant 0 : index
    %3 = vector.load %arg2[%c0_3, %c0_4] : memref<1x128xf32, #tpu.memory_space<vmem>>, vector<1x128xf32>
    %4 = vector.broadcast %3 : vector<1x128xf32> to vector<512x128xf32>
    %5 = arith.addf %2, %4 : vector<512x128xf32>
    %cst_5 = arith.constant 3.000000e+00 : f32
    %6 = vector.broadcast %cst_5 : f32 to vector<512x128xf32>
    %7 = arith.minimumf %5, %6 : vector<512x128xf32>
    %8 = tpu.iota {dimensions = array<i32: 0>} : vector<512x128xi32>
    %c486_i32 = arith.constant 486 : i32
    %9 = vector.broadcast %c486_i32 : i32 to vector<512x128xi32>
    %10 = arith.cmpi slt, %8, %9 : vector<512x128xi32>
    %cst_6 = arith.constant 0.000000e+00 : f32
    %11 = vector.broadcast %cst_6 : f32 to vector<512x128xf32>
    %12 = arith.select %10, %7, %11 : vector<512x128xi1>, vector<512x128xf32>
    %cst_7 = arith.constant dense<0.000000e+00> : vector<512xf32>
    %13 = vector.multi_reduction <add>, %12, %cst_7 [1] : vector<512x128xf32> to vector<512xf32>
    %14 = vector.shape_cast %13 : vector<512xf32> to vector<512x1xf32>
    %15 = vector.shape_cast %14 : vector<512x1xf32> to vector<1x512x1xf32>
    %cst_8 = arith.constant dense<0.000000e+00> : vector<1xf32>
    %16 = vector.multi_reduction <add>, %15, %cst_8 [1, 2] : vector<1x512x1xf32> to vector<1xf32>
    %17 = vector.shape_cast %16 : vector<1xf32> to vector<1x1x1xf32>
    %18 = vector.extract %17[0, 0, 0] : f32 from vector<1x1x1xf32>
    %cst_9 = arith.constant 1.000000e+00 : f32
    %cst_10 = arith.constant 3.000000e+00 : f32
    %19 = arith.maximumf %cst_9, %18 : f32
    %20 = arith.minimumf %cst_10, %19 : f32
    %c0_11 = arith.constant 0 : index
    %c0_12 = arith.constant 0 : index
    %21 = memref.load %arg3[%c0_11, %c0_12] : memref<1x1xf32, #tpu.memory_space<smem>>
    memref.store %20, %arg3[%c0_11, %c0_12] : memref<1x1xf32, #tpu.memory_space<smem>>
    return
  }
}

</mosaic_0001>

<bundles_post_ra>
// kernel: model_forward.1
= control target key start
LH: loop header
LB: loop body
LE: loop exit
PB: predicated region body
PF: predicated region fallthrough
CT: control target
= control target key end

     0   :  { %s1794_s0 = inlined_call_operand.vmem [shape: f32[512,128], index: 0, kind: input, shape index: {}]   ;;  %s1795_s1 = inlined_call_operand.vmem [shape: f32[128,128], index: 1, kind: input, shape index: {}]   ;;  %s1796_s2 = inlined_call_operand.vmem [shape: f32[1,128], index: 2, kind: input, shape index: {}]   ;;  %s1797_s3 = inlined_call_operand.hbm [shape: f32[1,1], index: 3, kind: output, shape index: {}]  }
   0x1   :  { %v79_v0 = vld [vmem:[%s1795_s1] sm:$0xff]  ;;  %v80_v1 = vld [vmem:[%s1795_s1 + $0x8] sm:$0xff]  ;;  %v81_v2 = vld [vmem:[%s1795_s1 + $0x10] sm:$0xff] }
   0x2   :  { %v1235_v3 = vpack.c.bf16 %v80_v1, %v79_v0  ;;  %v82_v4 = vld [vmem:[%s1795_s1 + $0x18] sm:$0xff]  ;;  %v83_v6 = vld [vmem:[%s1795_s1 + $0x20] sm:$0xff]  ;;  %v84_v7 = vld [vmem:[%s1795_s1 + $0x28] sm:$0xff] }
   0x3   :  { %v1239_v5 = vpack.c.bf16 %v82_v4, %v81_v2  ;;  %v1243_v8 = vpack.c.bf16 %v84_v7, %v83_v6  ;;  %v15_v9 = vld [vmem:[%s1794_s0] sm:$0xff]  ;;  %v85_v10 = vld [vmem:[%s1795_s1 + $0x30] sm:$0xff]  ;;  %v86_v11 = vld [vmem:[%s1795_s1 + $0x38] sm:$0xff] }
   0x4   :  { %1236 = vmatprep.subr.bf16.mxu0 %v1235_v3  ;;  %1267 = vmatprep.subr.bf16.mxu1 %v1235_v3  ;;  %v1247_v12 = vpack.c.bf16 %v86_v11, %v85_v10  ;;  %v87_v13 = vld [vmem:[%s1795_s1 + $0x40] sm:$0xff]  ;;  %v88_v14 = vld [vmem:[%s1795_s1 + $0x48] sm:$0xff]  ;;  %v89_v16 = vld [vmem:[%s1795_s1 + $0x50] sm:$0xff] }
   0x5   :  { %1238 = vmatpush3.bf16.msra.mxu0 %v1235_v3  ;;  %1275 = vmatpush3.bf16.msra.mxu1 %v1235_v3  ;;  %v1251_v15 = vpack.c.bf16 %v88_v14, %v87_v13  ;;  %v90_v17 = vld [vmem:[%s1795_s1 + $0x58] sm:$0xff]  ;;  %v47_v18 = vld [vmem:[%s1794_s0 + $0x100] sm:$0xff]  ;;  %v92_v21 = vld [vmem:[%s1795_s1 + $0x68] sm:$0xff] }
   0x6   :  { %1240 = vmatprep.subr.bf16.mxu0 %v1239_v5  ;;  %1268 = vmatprep.subr.bf16.mxu1 %v1239_v5  ;;  %v1255_v19 = vpack.c.bf16 %v90_v17, %v89_v16  ;;  %v91_v20 = vld [vmem:[%s1795_s1 + $0x60] sm:$0xff]  ;;  %v93_v23 = vld [vmem:[%s1795_s1 + $0x70] sm:$0xff]  ;;  %v94_v24 = vld [vmem:[%s1795_s1 + $0x78] sm:$0xff] }
   0x7   :  { %1139 = vmatprep.mubr.f32.mxu0 %v15_v9  ;;  %1187 = vmatprep.mubr.f32.mxu1 %v47_v18  ;;  %v1259_v22 = vpack.c.bf16 %v92_v21, %v91_v20  ;;  %v1263_v25 = vpack.c.bf16 %v94_v24, %v93_v23 }
   0x9   :  { %1242 = vmatpush3.bf16.msra.mxu0 %v1239_v5  ;;  %1276 = vmatpush3.bf16.msra.mxu1 %v1239_v5 }
   0xa   :  { %1244 = vmatprep.subr.bf16.mxu0 %v1243_v8  ;;  %1269 = vmatprep.subr.bf16.mxu1 %v1243_v8 }
   0xd   :  { %1246 = vmatpush3.bf16.msra.mxu0 %v1243_v8  ;;  %1277 = vmatpush3.bf16.msra.mxu1 %v1243_v8 }
   0xe   :  { %1248 = vmatprep.subr.bf16.mxu0 %v1247_v12  ;;  %1270 = vmatprep.subr.bf16.mxu1 %v1247_v12 }
  0x11   :  { %1250 = vmatpush3.bf16.msra.mxu0 %v1247_v12  ;;  %1278 = vmatpush3.bf16.msra.mxu1 %v1247_v12 }
  0x12   :  { %1252 = vmatprep.subr.bf16.mxu0 %v1251_v15  ;;  %1271 = vmatprep.subr.bf16.mxu1 %v1251_v15 }
  0x15   :  { %1254 = vmatpush3.bf16.msra.mxu0 %v1251_v15  ;;  %1279 = vmatpush3.bf16.msra.mxu1 %v1251_v15 }
  0x16   :  { %1256 = vmatprep.subr.bf16.mxu0 %v1255_v19  ;;  %1272 = vmatprep.subr.bf16.mxu1 %v1255_v19 }
  0x19   :  { %1258 = vmatpush3.bf16.msra.mxu0 %v1255_v19  ;;  %1280 = vmatpush3.bf16.msra.mxu1 %v1255_v19 }
  0x1a   :  { %1260 = vmatprep.subr.bf16.mxu0 %v1259_v22  ;;  %1273 = vmatprep.subr.bf16.mxu1 %v1259_v22 }
  0x1b   :  { %8 = vsyncpa [#allocation3], 0  ;;  %v16_v26 = vld [vmem:[%s1794_s0 + $0x8] sm:$0xff]  ;;  %v17_v28 = vld [vmem:[%s1794_s0 + $0x10] sm:$0xff]  ;;  %vm872_vm1 = vcmask 7168   ;;  %s1302_s6 = smov 1.0  }
  0x1c   :  { %v48_v27 = vld [vmem:[%s1794_s0 + $0x108] sm:$0xff]  ;;  %v49_v29 = vld [vmem:[%s1794_s0 + $0x110] sm:$0xff]  ;;  %v18_v30 = vld [vmem:[%s1794_s0 + $0x18] sm:$0xff]  ;;  %s1303_s8 = smov 3.0   ;;  %s1289_s12 = scalar_lea.hbm %s1797_s3, 16 }
  0x1d   :  { %1262 = vmatpush3.bf16.msra.mxu0 %v1259_v22  ;;  %1281 = vmatpush3.bf16.msra.mxu1 %v1259_v22  ;;  %v50_v31 = vld [vmem:[%s1794_s0 + $0x118] sm:$0xff]  ;;  %v19_v32 = vld [vmem:[%s1794_s0 + $0x20] sm:$0xff]  ;;  %v20_v34 = vld [vmem:[%s1794_s0 + $0x28] sm:$0xff]  ;;  %p1290_p0 = scmp.ne.s32.totalorder %s1797_s3, %s1289_s12  ;;  %p1293_p1 = scmp.lt.u32.totalorder %s1289_s12, %s1797_s3 }
  0x1e   :  { %1264 = vmatprep.subr.bf16.mxu0 %v1263_v25  ;;  %1274 = vmatprep.subr.bf16.mxu1 %v1263_v25  ;;  %v51_v33 = vld [vmem:[%s1794_s0 + $0x120] sm:$0xff]  ;;  %v52_v35 = vld [vmem:[%s1794_s0 + $0x128] sm:$0xff]  ;;  %v21_v36 = vld [vmem:[%s1794_s0 + $0x30] sm:$0xff] }
  0x1f   :  { %v53_v37 = vld [vmem:[%s1794_s0 + $0x130] sm:$0xff]  ;;  %v22_v38 = vld [vmem:[%s1794_s0 + $0x38] sm:$0xff]  ;;  %v23_v40 = vld [vmem:[%s1794_s0 + $0x40] sm:$0xff]  ;;  %p1295_p2 = pnand %p1293_p1, %p1290_p0 }
  0x20   :  { %v54_v39 = vld [vmem:[%s1794_s0 + $0x138] sm:$0xff]  ;;  %v55_v41 = vld [vmem:[%s1794_s0 + $0x140] sm:$0xff]  ;;  %v24_v42 = vld [vmem:[%s1794_s0 + $0x48] sm:$0xff] }
  0x21   :  { %1266 = vmatpush3.bf16.msra.mxu0 %v1263_v25  ;;  %1282 = vmatpush3.bf16.msra.mxu1 %v1263_v25  ;;  %v56_v43 = vld [vmem:[%s1794_s0 + $0x148] sm:$0xff]  ;;  %v25_v44 = vld [vmem:[%s1794_s0 + $0x50] sm:$0xff]  ;;  %v26_v46 = vld [vmem:[%s1794_s0 + $0x58] sm:$0xff] }
  0x22   :  { %v57_v45 = vld [vmem:[%s1794_s0 + $0x150] sm:$0xff]  ;;  %v58_v47 = vld [vmem:[%s1794_s0 + $0x158] sm:$0xff]  ;;  %v27_v48 = vld [vmem:[%s1794_s0 + $0x60] sm:$0xff] }
  0x23   :  { %v59_v49 = vld [vmem:[%s1794_s0 + $0x160] sm:$0xff]  ;;  %v28_v50 = vld [vmem:[%s1794_s0 + $0x68] sm:$0xff]  ;;  %v29_v52 = vld [vmem:[%s1794_s0 + $0x70] sm:$0xff] }
  0x24   :  { %1140 = vmatmul.mubr.f32.vlgmr.msra.gmra.mrb[0].mxu0 %v16_v26  ;;  %1188 = vmatmul.mubr.f32.vlgmr.msra.gmra.mrb[0].mxu1 %v48_v27  ;;  %v60_v51 = vld [vmem:[%s1794_s0 + $0x168] sm:$0xff]  ;;  %v61_v53 = vld [vmem:[%s1794_s0 + $0x170] sm:$0xff]  ;;  %v30_v54 = vld [vmem:[%s1794_s0 + $0x78] sm:$0xff] }
  0x25   :  { %1142 = vmatprep.mubr.f32.mxu0 %v17_v28  ;;  %1190 = vmatprep.mubr.f32.mxu1 %v49_v29  ;;  %v62_v55 = vld [vmem:[%s1794_s0 + $0x178] sm:$0xff]  ;;  %v31_v56 = vld [vmem:[%s1794_s0 + $0x80] sm:$0xff]  ;;  %v32_v58 = vld [vmem:[%s1794_s0 + $0x88] sm:$0xff] }
  0x26   :  { %v63_v57 = vld [vmem:[%s1794_s0 + $0x180] sm:$0xff]  ;;  %v64_v59 = vld [vmem:[%s1794_s0 + $0x188] sm:$0xff]  ;;  %v33_v60 = vld [vmem:[%s1794_s0 + $0x90] sm:$0xff] }
  0x27   :  { %v65_v61 = vld [vmem:[%s1794_s0 + $0x190] sm:$0xff]  ;;  %v34_v62 = vld [vmem:[%s1794_s0 + $0x98] sm:$0xff]  ;;  %v35_v0 = vld [vmem:[%s1794_s0 + $0xa0] sm:$0xff] }
  0x28   :  { %1143 = vmatmul.mubr.f32.gmra.mrb[2].mxu0 %v18_v30  ;;  %1191 = vmatmul.mubr.f32.gmra.mrb[2].mxu1 %v50_v31  ;;  %v66_v63 = vld [vmem:[%s1794_s0 + $0x198] sm:$0xff]  ;;  %v67_v1 = vld [vmem:[%s1794_s0 + $0x1a0] sm:$0xff]  ;;  %v36_v2 = vld [vmem:[%s1794_s0 + $0xa8] sm:$0xff] }
  0x29   :  { %1145 = vmatprep.mubr.f32.mxu0 %v19_v32  ;;  %1193 = vmatprep.mubr.f32.mxu1 %v51_v33  ;;  %v68_v3 = vld [vmem:[%s1794_s0 + $0x1a8] sm:$0xff]  ;;  %v37_v4 = vld [vmem:[%s1794_s0 + $0xb0] sm:$0xff]  ;;  %v38_v6 = vld [vmem:[%s1794_s0 + $0xb8] sm:$0xff] }
  0x2a   :  { %v69_v5 = vld [vmem:[%s1794_s0 + $0x1b0] sm:$0xff]  ;;  %v70_v7 = vld [vmem:[%s1794_s0 + $0x1b8] sm:$0xff]  ;;  %v39_v8 = vld [vmem:[%s1794_s0 + $0xc0] sm:$0xff] }
  0x2b   :  { %v71_v9 = vld [vmem:[%s1794_s0 + $0x1c0] sm:$0xff]  ;;  %v40_v10 = vld [vmem:[%s1794_s0 + $0xc8] sm:$0xff]  ;;  %v41_v12 = vld [vmem:[%s1794_s0 + $0xd0] sm:$0xff] }
  0x2c   :  { %1146 = vmatmul.mubr.f32.gmra.mrb[4].mxu0 %v20_v34  ;;  %1194 = vmatmul.mubr.f32.gmra.mrb[4].mxu1 %v52_v35  ;;  %v72_v11 = vld [vmem:[%s1794_s0 + $0x1c8] sm:$0xff]  ;;  %v73_v13 = vld [vmem:[%s1794_s0 + $0x1d0] sm:$0xff]  ;;  %v42_v14 = vld [vmem:[%s1794_s0 + $0xd8] sm:$0xff] }
  0x2d   :  { %1148 = vmatprep.mubr.f32.mxu0 %v21_v36  ;;  %1196 = vmatprep.mubr.f32.mxu1 %v53_v37  ;;  %v74_v15 = vld [vmem:[%s1794_s0 + $0x1d8] sm:$0xff]  ;;  %v43_v16 = vld [vmem:[%s1794_s0 + $0xe0] sm:$0xff]  ;;  %v44_v18 = vld [vmem:[%s1794_s0 + $0xe8] sm:$0xff] }
  0x2e   :  { %v75_v17 = vld [vmem:[%s1794_s0 + $0x1e0] sm:$0xff]  ;;  %v76_v19 = vld [vmem:[%s1794_s0 + $0x1e8] sm:$0xff]  ;;  %v45_v20 = vld [vmem:[%s1794_s0 + $0xf0] sm:$0xff] }
  0x2f   :  { %v46_v21 = vld [vmem:[%s1794_s0 + $0xf8] sm:$0xff]  ;;  %v1562_v22 = vld [vmem:[%s1796_s2] ss:$0 sm:$0xff] }
  0x30   :  { %1149 = vmatmul.mubr.f32.gmra.mrb[6].mxu0 %v22_v38  ;;  %1197 = vmatmul.mubr.f32.gmra.mrb[6].mxu1 %v54_v39 }
  0x31   :  { %1151 = vmatprep.mubr.f32.mxu0 %v23_v40  ;;  %1199 = vmatprep.mubr.f32.mxu1 %v55_v41 }
  0x34   :  { %1152 = vmatmul.mubr.f32.gmra.mrb[8].mxu0 %v24_v42  ;;  %1200 = vmatmul.mubr.f32.gmra.mrb[8].mxu1 %v56_v43 }
  0x35   :  { %1154 = vmatprep.mubr.f32.mxu0 %v25_v44  ;;  %1202 = vmatprep.mubr.f32.mxu1 %v57_v45 }
  0x38   :  { %1155 = vmatmul.mubr.f32.gmra.mrb[10].mxu0 %v26_v46  ;;  %1203 = vmatmul.mubr.f32.gmra.mrb[10].mxu1 %v58_v47 }
  0x39   :  { %1157 = vmatprep.mubr.f32.mxu0 %v27_v48  ;;  %1205 = vmatprep.mubr.f32.mxu1 %v59_v49 }
  0x3c   :  { %1158 = vmatmul.mubr.f32.gmra.mrb[12].mxu0 %v28_v50  ;;  %1206 = vmatmul.mubr.f32.gmra.mrb[12].mxu1 %v60_v51 }
  0x3d   :  { %1160 = vmatprep.mubr.f32.mxu0 %v29_v52  ;;  %1208 = vmatprep.mubr.f32.mxu1 %v61_v53 }
  0x40   :  { %1161 = vmatmul.mubr.f32.gmra.mrb[14].mxu0 %v30_v54  ;;  %1209 = vmatmul.mubr.f32.gmra.mrb[14].mxu1 %v62_v55 }
  0x41   :  { %1163 = vmatprep.mubr.f32.mxu0 %v31_v56  ;;  %1211 = vmatprep.mubr.f32.mxu1 %v63_v57 }
  0x44   :  { %1164 = vmatmul.mubr.f32.gmra.mrb[16].mxu0 %v32_v58  ;;  %1212 = vmatmul.mubr.f32.gmra.mrb[16].mxu1 %v64_v59 }
  0x45   :  { %1166 = vmatprep.mubr.f32.mxu0 %v33_v60  ;;  %1214 = vmatprep.mubr.f32.mxu1 %v65_v61 }
  0x48   :  { %1167 = vmatmul.mubr.f32.gmra.mrb[18].mxu0 %v34_v62  ;;  %1215 = vmatmul.mubr.f32.gmra.mrb[18].mxu1 %v66_v63 }
  0x49   :  { %1169 = vmatprep.mubr.f32.mxu0 %v35_v0  ;;  %1217 = vmatprep.mubr.f32.mxu1 %v67_v1 }
  0x4c   :  { %1170 = vmatmul.mubr.f32.gmra.mrb[20].mxu0 %v36_v2  ;;  %1218 = vmatmul.mubr.f32.gmra.mrb[20].mxu1 %v68_v3 }
  0x4d   :  { %1172 = vmatprep.mubr.f32.mxu0 %v37_v4  ;;  %1220 = vmatprep.mubr.f32.mxu1 %v69_v5 }
  0x50   :  { %1173 = vmatmul.mubr.f32.gmra.mrb[22].mxu0 %v38_v6  ;;  %1221 = vmatmul.mubr.f32.gmra.mrb[22].mxu1 %v70_v7 }
  0x51   :  { %1175 = vmatprep.mubr.f32.mxu0 %v39_v8  ;;  %1223 = vmatprep.mubr.f32.mxu1 %v71_v9 }
  0x54   :  { %1176 = vmatmul.mubr.f32.gmra.mrb[24].mxu0 %v40_v10  ;;  %1224 = vmatmul.mubr.f32.gmra.mrb[24].mxu1 %v72_v11 }
  0x55   :  { %1178 = vmatprep.mubr.f32.mxu0 %v41_v12  ;;  %1226 = vmatprep.mubr.f32.mxu1 %v73_v13 }
  0x58   :  { %1179 = vmatmul.mubr.f32.gmra.mrb[26].mxu0 %v42_v14  ;;  %1227 = vmatmul.mubr.f32.gmra.mrb[26].mxu1 %v74_v15 }
  0x59   :  { %1181 = vmatprep.mubr.f32.mxu0 %v43_v16  ;;  %1229 = vmatprep.mubr.f32.mxu1 %v75_v17 }
  0x5c   :  { %1182 = vmatmul.mubr.f32.gmra.mrb[28].mxu0 %v44_v18  ;;  %1230 = vmatmul.mubr.f32.gmra.mrb[28].mxu1 %v76_v19 }
  0x5d   :  { %1184 = vmatprep.mubr.f32.mxu0 %v45_v20 }
  0x60   :  { %1185 = vmatmul.mubr.f32.gmra.mrb[30].mxu0 %v46_v21 }
  0xf7   :  { %v1141_v23 = vpop.f32.mrb[0].mxu0  ;;  %v1189_v24 = vpop.f32.mrb[0].mxu1 }
  0xf8   :  { %v168_v25 = vpop.f32.mrb[1].mxu0  ;;  %v1565_v26 = vadd.f32 %v1189_v24, %v1562_v22  ;;  %v328_v27 = vpop.f32.mrb[1].mxu1  ;;  %v174_v30 = vadd.f32 %v1141_v23, %v1562_v22 }
  0xf9   :  { %v169_v28 = vadd.f32 %v1562_v22, %v168_v25  ;;  %v1569_v29 = vadd.f32 %v1562_v22, %v328_v27 }
  0xfa   :  { %v488_v39 = vmin.f32 %v174_v30, 3.0 }
  0xfb   :  { %v1144_v31 = vpop.f32.mrb[2].mxu0  ;;  %v487_v32 = vmin.f32 %v169_v28, 3.0  ;;  %v1192_v33 = vpop.f32.mrb[2].mxu1 }
  0xfc   :  { %v178_v34 = vpop.f32.mrb[3].mxu0  ;;  %v1573_v35 = vadd.f32 %v1192_v33, %v1562_v22  ;;  %v338_v36 = vpop.f32.mrb[3].mxu1  ;;  %v184_v40 = vadd.f32 %v1144_v31, %v1562_v22 }
  0xfd   :  { %744 = vadd.xlane.f32.xlu0 %v487_v32  ;;  %v179_v37 = vadd.f32 %v1562_v22, %v178_v34  ;;  %v1577_v38 = vadd.f32 %v1562_v22, %v338_v36 }
  0xfe   :  { %v490_v49 = vmin.f32 %v184_v40, 3.0 }
  0xff   :  { %v1147_v41 = vpop.f32.mrb[4].mxu0  ;;  %v489_v42 = vmin.f32 %v179_v37, 3.0  ;;  %v1195_v43 = vpop.f32.mrb[4].mxu1 }
 0x100   :  { %v188_v44 = vpop.f32.mrb[5].mxu0  ;;  %v1581_v45 = vadd.f32 %v1195_v43, %v1562_v22  ;;  %v348_v46 = vpop.f32.mrb[5].mxu1  ;;  %v194_v50 = vadd.f32 %v1147_v41, %v1562_v22 }
 0x101   :  { %v189_v47 = vadd.f32 %v1562_v22, %v188_v44  ;;  %748 = vadd.xlane.f32.xlu1 %v489_v42  ;;  %746 = vadd.xlane.f32.xlu0 %v488_v39  ;;  %v1585_v48 = vadd.f32 %v1562_v22, %v348_v46 }
 0x102   :  { %v492_v59 = vmin.f32 %v194_v50, 3.0 }
 0x103   :  { %v491_v51 = vmin.f32 %v189_v47, 3.0  ;;  %v1150_v52 = vpop.f32.mrb[6].mxu0  ;;  %v1198_v53 = vpop.f32.mrb[6].mxu1 }
 0x104   :  { %v198_v54 = vpop.f32.mrb[7].mxu0  ;;  %v1589_v55 = vadd.f32 %v1198_v53, %v1562_v22  ;;  %v358_v56 = vpop.f32.mrb[7].mxu1  ;;  %v204_v60 = vadd.f32 %v1150_v52, %v1562_v22 }
 0x105   :  { %v199_v57 = vadd.f32 %v1562_v22, %v198_v54  ;;  %750 = vadd.xlane.f32.xlu1 %v490_v49  ;;  %752 = vadd.xlane.f32.xlu0 %v491_v51  ;;  %v1593_v58 = vadd.f32 %v1562_v22, %v358_v56 }
 0x106   :  { %v494_v5 = vmin.f32 %v204_v60, 3.0 }
 0x107   :  { %v493_v61 = vmin.f32 %v199_v57, 3.0  ;;  %v1153_v62 = vpop.f32.mrb[8].mxu0  ;;  %v1201_v63 = vpop.f32.mrb[8].mxu1 }
 0x108   :  { %v208_v0 = vpop.f32.mrb[9].mxu0  ;;  %v1597_v1 = vadd.f32 %v1201_v63, %v1562_v22  ;;  %v368_v2 = vpop.f32.mrb[9].mxu1  ;;  %v214_v6 = vadd.f32 %v1153_v62, %v1562_v22 }
 0x109   :  { %v209_v3 = vadd.f32 %v1562_v22, %v208_v0  ;;  %754 = vadd.xlane.f32.xlu1 %v492_v59  ;;  %756 = vadd.xlane.f32.xlu0 %v493_v61  ;;  %v1601_v4 = vadd.f32 %v1562_v22, %v368_v2 }
 0x10a   :  { %v496_v15 = vmin.f32 %v214_v6, 3.0 }
 0x10b   :  { %v495_v7 = vmin.f32 %v209_v3, 3.0  ;;  %v1156_v8 = vpop.f32.mrb[10].mxu0  ;;  %v1204_v9 = vpop.f32.mrb[10].mxu1 }
 0x10c   :  { %v218_v10 = vpop.f32.mrb[11].mxu0  ;;  %v1605_v11 = vadd.f32 %v1204_v9, %v1562_v22  ;;  %v378_v12 = vpop.f32.mrb[11].mxu1  ;;  %v224_v16 = vadd.f32 %v1156_v8, %v1562_v22 }
 0x10d   :  { %v219_v13 = vadd.f32 %v1562_v22, %v218_v10  ;;  %758 = vadd.xlane.f32.xlu1 %v494_v5  ;;  %760 = vadd.xlane.f32.xlu0 %v495_v7  ;;  %v1609_v14 = vadd.f32 %v1562_v22, %v378_v12 }
 0x10e   :  { %v498_v27 = vmin.f32 %v224_v16, 3.0 }
 0x10f   :  { %v497_v17 = vmin.f32 %v219_v13, 3.0  ;;  %v1159_v18 = vpop.f32.mrb[12].mxu0  ;;  %v1207_v19 = vpop.f32.mrb[12].mxu1 }
 0x110   :  { %v228_v20 = vpop.f32.mrb[13].mxu0  ;;  %v1613_v21 = vadd.f32 %v1207_v19, %v1562_v22  ;;  %v388_v23 = vpop.f32.mrb[13].mxu1  ;;  %v234_v28 = vadd.f32 %v1159_v18, %v1562_v22 }
 0x111   :  { %v229_v24 = vadd.f32 %v1562_v22, %v228_v20  ;;  %762 = vadd.xlane.f32.xlu1 %v496_v15  ;;  %764 = vadd.xlane.f32.xlu0 %v497_v17  ;;  %v1617_v25 = vadd.f32 %v1562_v22, %v388_v23 }
 0x112   :  { %v500_v40 = vmin.f32 %v234_v28, 3.0 }
 0x113   :  { %v499_v30 = vmin.f32 %v229_v24, 3.0  ;;  %v1162_v31 = vpop.f32.mrb[14].mxu0  ;;  %v1210_v32 = vpop.f32.mrb[14].mxu1 }
 0x114   :  { %v238_v33 = vpop.f32.mrb[15].mxu0  ;;  %v1621_v34 = vadd.f32 %v1210_v32, %v1562_v22  ;;  %v398_v36 = vpop.f32.mrb[15].mxu1  ;;  %v244_v41 = vadd.f32 %v1162_v31, %v1562_v22 }
 0x115   :  { %v239_v37 = vadd.f32 %v1562_v22, %v238_v33  ;;  %766 = vadd.xlane.f32.xlu1 %v498_v27  ;;  %768 = vadd.xlane.f32.xlu0 %v499_v30  ;;  %v1625_v39 = vadd.f32 %v1562_v22, %v398_v36 }
 0x116   :  { %v502_v52 = vmin.f32 %v244_v41, 3.0 }
 0x117   :  { %v501_v42 = vmin.f32 %v239_v37, 3.0  ;;  %v1165_v43 = vpop.f32.mrb[16].mxu0  ;;  %v1213_v44 = vpop.f32.mrb[16].mxu1 }
 0x118   :  { %v248_v46 = vpop.f32.mrb[17].mxu0  ;;  %v1629_v47 = vadd.f32 %v1213_v44, %v1562_v22  ;;  %v408_v49 = vpop.f32.mrb[17].mxu1  ;;  %v254_v53 = vadd.f32 %v1165_v43, %v1562_v22 }
 0x119   :  { %v249_v50 = vadd.f32 %v1562_v22, %v248_v46  ;;  %770 = vadd.xlane.f32.xlu1 %v500_v40  ;;  %772 = vadd.xlane.f32.xlu0 %v501_v42  ;;  %v1633_v51 = vadd.f32 %v1562_v22, %v408_v49 }
 0x11a   :  { %v504_v0 = vmin.f32 %v254_v53, 3.0 }
 0x11b   :  { %v503_v54 = vmin.f32 %v249_v50, 3.0  ;;  %v1168_v56 = vpop.f32.mrb[18].mxu0  ;;  %v1216_v57 = vpop.f32.mrb[18].mxu1 }
 0x11c   :  { %v258_v59 = vpop.f32.mrb[19].mxu0  ;;  %v1637_v60 = vadd.f32 %v1216_v57, %v1562_v22  ;;  %v418_v61 = vpop.f32.mrb[19].mxu1  ;;  %v264_v2 = vadd.f32 %v1168_v56, %v1562_v22 }
 0x11d   :  { %v259_v62 = vadd.f32 %v1562_v22, %v258_v59  ;;  %774 = vadd.xlane.f32.xlu1 %v502_v52  ;;  %776 = vadd.xlane.f32.xlu0 %v503_v54  ;;  %v1641_v63 = vadd.f32 %v1562_v22, %v418_v61 }
 0x11e   :  { %v506_v13 = vmin.f32 %v264_v2, 3.0 }
 0x11f   :  { %v505_v3 = vmin.f32 %v259_v62, 3.0  ;;  %v1171_v5 = vpop.f32.mrb[20].mxu0  ;;  %v1219_v6 = vpop.f32.mrb[20].mxu1 }
 0x120   :  { %v268_v7 = vpop.f32.mrb[21].mxu0  ;;  %v1645_v8 = vadd.f32 %v1219_v6, %v1562_v22  ;;  %v428_v9 = vpop.f32.mrb[21].mxu1  ;;  %v274_v15 = vadd.f32 %v1171_v5, %v1562_v22 }
 0x121   :  { %v269_v10 = vadd.f32 %v1562_v22, %v268_v7  ;;  %778 = vadd.xlane.f32.xlu1 %v504_v0  ;;  %780 = vadd.xlane.f32.xlu0 %v505_v3  ;;  %v1649_v12 = vadd.f32 %v1562_v22, %v428_v9 }
 0x122   :  { %v508_v28 = vmin.f32 %v274_v15, 3.0 }
 0x123   :  { %v507_v16 = vmin.f32 %v269_v10, 3.0  ;;  %v1174_v17 = vpop.f32.mrb[22].mxu0  ;;  %v1222_v18 = vpop.f32.mrb[22].mxu1 }
 0x124   :  { %v278_v19 = vpop.f32.mrb[23].mxu0  ;;  %v1653_v20 = vadd.f32 %v1222_v18, %v1562_v22  ;;  %v438_v23 = vpop.f32.mrb[23].mxu1  ;;  %v284_v30 = vadd.f32 %v1174_v17, %v1562_v22 }
 0x125   :  { %v279_v24 = vadd.f32 %v1562_v22, %v278_v19  ;;  %782 = vadd.xlane.f32.xlu1 %v506_v13  ;;  %784 = vadd.xlane.f32.xlu0 %v507_v16  ;;  %v1657_v27 = vadd.f32 %v1562_v22, %v438_v23 }
 0x126   :  { %v510_v43 = vmin.f32 %v284_v30, 3.0  ;;  %v521_v30 = vmin.f32 %v1577_v38, 3.0  ;;  %v526_v38 = vmin.f32 %v1589_v55, 3.0  ;;  %v535_v55 = vmin.f32 %v1633_v51, 3.0 }
 0x127   :  { %v509_v31 = vmin.f32 %v279_v24, 3.0  ;;  %v1177_v32 = vpop.f32.mrb[24].mxu0  ;;  %v1225_v33 = vpop.f32.mrb[24].mxu1  ;;  %v519_v24 = vmin.f32 %v1569_v29, 3.0  ;;  %v524_v29 = vmin.f32 %v1581_v45, 3.0  ;;  %v533_v45 = vmin.f32 %v1625_v39, 3.0 }
 0x128   :  { %v288_v36 = vpop.f32.mrb[25].mxu0  ;;  %v1661_v37 = vadd.f32 %v1225_v33, %v1562_v22  ;;  %v448_v40 = vpop.f32.mrb[25].mxu1  ;;  %v294_v44 = vadd.f32 %v1177_v32, %v1562_v22  ;;  %v523_v32 = vmin.f32 %v1585_v48, 3.0  ;;  %v525_v33 = vmin.f32 %v1593_v58, 3.0 }
 0x129   :  { %v289_v41 = vadd.f32 %v1562_v22, %v288_v36  ;;  %786 = vadd.xlane.f32.xlu1 %v508_v28  ;;  %788 = vadd.xlane.f32.xlu0 %v509_v31  ;;  %v1665_v42 = vadd.f32 %v1562_v22, %v448_v40  ;;  %v520_v31 = vmin.f32 %v1565_v26, 3.0  ;;  %v527_v36 = vmin.f32 %v1601_v4, 3.0 }
 0x12a   :  { %v512_v59 = vmin.f32 %v294_v44, 3.0  ;;  %v529_v26 = vmin.f32 %v1609_v14, 3.0  ;;  %v528_v48 = vmin.f32 %v1597_v1, 3.0  ;;  %v530_v58 = vmin.f32 %v1605_v11, 3.0 }
 0x12b   :  { %v511_v46 = vmin.f32 %v289_v41, 3.0  ;;  %v1180_v49 = vpop.f32.mrb[26].mxu0  ;;  %v1228_v50 = vpop.f32.mrb[26].mxu1  ;;  %v532_v4 = vmin.f32 %v1613_v21, 3.0  ;;  %v534_v14 = vmin.f32 %v1621_v34, 3.0  ;;  %v537_v1 = vmin.f32 %v1641_v63, 3.0 }
 0x12c   :  { %v298_v52 = vpop.f32.mrb[27].mxu0  ;;  %v1669_v53 = vadd.f32 %v1228_v50, %v1562_v22  ;;  %v458_v54 = vpop.f32.mrb[27].mxu1  ;;  %v304_v61 = vadd.f32 %v1180_v49, %v1562_v22  ;;  %v539_v11 = vmin.f32 %v1649_v12, 3.0  ;;  %v538_v39 = vmin.f32 %v1637_v60, 3.0 }
 0x12d   :  { %v299_v56 = vadd.f32 %v1562_v22, %v298_v52  ;;  %790 = vadd.xlane.f32.xlu1 %v510_v43  ;;  %792 = vadd.xlane.f32.xlu0 %v511_v46  ;;  %v1673_v57 = vadd.f32 %v1562_v22, %v458_v54  ;;  %v551_v40 = vlaneseq  ;;  %v541_v21 = vmin.f32 %v1657_v27, 3.0 }
 0x12e   :  { %v514_v9 = vmin.f32 %v304_v61, 3.0  ;;  %v540_v51 = vmin.f32 %v1645_v8, 3.0  ;;  %v543_v63 = vmin.f32 %v1665_v42, 3.0  ;;  %v544_v27 = vmin.f32 %v1661_v37, 3.0  ;;  %v78_v37 = vld [vmem:[%s1794_s0 + $0x1f8] sm:$0xff] }
 0x12f   :  { %v513_v62 = vmin.f32 %v299_v56, 3.0  ;;  %v1183_v0 = vpop.f32.mrb[28].mxu0  ;;  %v1231_v2 = vpop.f32.mrb[28].mxu1  ;;  %v552_v34 = vshrl.u32 %v551_v40, 7  ;;  %v545_v12 = vmin.f32 %v1673_v57, 3.0  ;;  %v546_v43 = vmin.f32 %v1669_v53, 3.0 }
 0x130   :  { %v308_v3 = vpop.f32.mrb[29].mxu0  ;;  %v468_v5 = vpop.f32.mrb[29].mxu1  ;;  %v314_v10 = vadd.f32 %v1183_v0, %v1562_v22  ;;  %v1301_v42 = vmov 0.0  }
 0x131   :  { %v309_v6 = vadd.f32 %v1562_v22, %v308_v3  ;;  %794 = vadd.xlane.f32.xlu1 %v512_v59  ;;  %796 = vadd.xlane.f32.xlu0 %v513_v62  ;;  %v1678_v7 = vadd.f32 %v1562_v22, %v468_v5  ;;  %v612_v41 = vadd.s32 480, %v552_v34 }
 0x132   :  { %v516_v19 = vmin.f32 %v314_v10, 3.0 }
 0x133   :  { %v515_v13 = vmin.f32 %v309_v6, 3.0  ;;  %v1186_v15 = vpop.f32.mrb[30].mxu0  ;;  %v547_v60 = vmin.f32 %v1678_v7, 3.0  ;;  %vm676_vm0 = vcmp.lt.s32.totalorder %v612_v41, 486 }
 0x134   :  { %v324_v16 = vadd.f32 %v1186_v15, %v1562_v22  ;;  %v318_v17 = vpop.f32.mrb[31].mxu0 }
 0x135   :  { %v319_v18 = vadd.f32 %v1562_v22, %v318_v17  ;;  %798 = vadd.xlane.f32.xlu1 %v514_v9  ;;  %800 = vadd.xlane.f32.xlu0 %v515_v13  ;;  %v522_v22 = vmin.f32 %v1573_v35, 3.0  ;;  %v531_v35 = vmin.f32 %v1617_v25, 3.0  ;;  %v536_v25 = vmin.f32 %v1629_v47, 3.0 }
 0x136   :  { %v518_v28 = vmin.f32 %v324_v16, 3.0  ;;  %v542_v47 = vmin.f32 %v1653_v20, 3.0  ;;  %v740_v8 = vsel %vm676_vm0, %v547_v60, 0.0  ;;  %v77_v20 = vld [vmem:[%s1794_s0 + $0x1f0] sm:$0xff] }
 0x137   :  { %v517_v23 = vmin.f32 %v319_v18, 3.0  ;;  %1232 = vmatprep.mubr.f32.mxu1 %v77_v20 }
 0x138   :  { %1233 = vmatmul.mubr.f32.gmra.mrb[30].mxu1 %v78_v37 }
 0x139   :  { %802 = vadd.xlane.f32.xlu1 %v516_v19  ;;  %804 = vadd.xlane.f32.xlu0 %v517_v23 }
 0x13d   :  { %806 = vadd.xlane.f32.xlu1 %v518_v28  ;;  %808 = vadd.xlane.f32.xlu0 %v519_v24 }
 0x141   :  { %810 = vadd.xlane.f32.xlu1 %v520_v31  ;;  %812 = vadd.xlane.f32.xlu0 %v521_v30 }
 0x145   :  { %814 = vadd.xlane.f32.xlu1 %v522_v22  ;;  %816 = vadd.xlane.f32.xlu0 %v523_v32 }
 0x149   :  { %818 = vadd.xlane.f32.xlu1 %v524_v29  ;;  %820 = vadd.xlane.f32.xlu0 %v525_v33 }
 0x14d   :  { %822 = vadd.xlane.f32.xlu1 %v526_v38  ;;  %824 = vadd.xlane.f32.xlu0 %v527_v36 }
 0x151   :  { %826 = vadd.xlane.f32.xlu1 %v528_v48  ;;  %828 = vadd.xlane.f32.xlu0 %v529_v26 }
 0x155   :  { %830 = vadd.xlane.f32.xlu1 %v530_v58  ;;  %832 = vadd.xlane.f32.xlu0 %v531_v35 }
 0x159   :  { %834 = vadd.xlane.f32.xlu1 %v532_v4  ;;  %836 = vadd.xlane.f32.xlu0 %v533_v45 }
 0x15d   :  { %838 = vadd.xlane.f32.xlu1 %v534_v14  ;;  %840 = vadd.xlane.f32.xlu0 %v535_v55 }
 0x161   :  { %842 = vadd.xlane.f32.xlu1 %v536_v25  ;;  %844 = vadd.xlane.f32.xlu0 %v537_v1 }
 0x165   :  { %846 = vadd.xlane.f32.xlu1 %v538_v39  ;;  %848 = vadd.xlane.f32.xlu0 %v539_v11 }
 0x169   :  { %850 = vadd.xlane.f32.xlu1 %v540_v51  ;;  %852 = vadd.xlane.f32.xlu0 %v541_v21 }
 0x16d   :  { %854 = vadd.xlane.f32.xlu1 %v542_v47  ;;  %856 = vadd.xlane.f32.xlu0 %v543_v63 }
 0x171   :  { %858 = vadd.xlane.f32.xlu1 %v544_v27  ;;  %860 = vadd.xlane.f32.xlu0 %v545_v12 }
 0x175   :  { %862 = vadd.xlane.f32.xlu1 %v546_v43  ;;  %864 = vadd.xlane.f32.xlu0 %v740_v8 }
 0x179   :  { %866 = vadd.xlane.f32.xlu1 %v1301_v42  ;;  %868 = vadd.xlane.f32.xlu0 %v1301_v42 }
 0x17d   :  { %870 = vadd.xlane.f32.xlu1 %v1301_v42 }
 0x18a   :  { %v745_v44 = vpop.xlane.xlu0 %744 }
 0x18b   :  { %v873_v50 = vsel %vm872_vm1, %v745_v44, 0.0 }
 0x18e   :  { %v749_v46 = vpop.xlane.xlu1 %748  ;;  %v747_v49 = vpop.xlane.xlu0 %746 }
 0x18f   :  { %v874_v52 = vsel %vm872_vm1, %v747_v49, 0.0  ;;  %v876_v54 = vsel %vm872_vm1, %v749_v46, 0.0 }
 0x190   :  { %v875_v53 = vadd.f32 %v874_v52, %v873_v50 }
 0x192   :  { %v877_v56 = vadd.f32 %v876_v54, %v875_v53  ;;  %v751_v57 = vpop.xlane.xlu1 %750  ;;  %v753_v59 = vpop.xlane.xlu0 %752 }
 0x193   :  { %v878_v61 = vsel %vm872_vm1, %v751_v57, 0.0  ;;  %v880_v62 = vsel %vm872_vm1, %v753_v59, 0.0 }
 0x194   :  { %v879_v0 = vadd.f32 %v878_v61, %v877_v56 }
 0x196   :  { %v881_v2 = vadd.f32 %v880_v62, %v879_v0  ;;  %v755_v3 = vpop.xlane.xlu1 %754  ;;  %v757_v5 = vpop.xlane.xlu0 %756 }
 0x197   :  { %v882_v6 = vsel %vm872_vm1, %v755_v3, 0.0  ;;  %v884_v7 = vsel %vm872_vm1, %v757_v5, 0.0 }
 0x198   :  { %v883_v9 = vadd.f32 %v882_v6, %v881_v2 }
 0x19a   :  { %v885_v10 = vadd.f32 %v884_v7, %v883_v9  ;;  %v759_v13 = vpop.xlane.xlu1 %758  ;;  %v761_v15 = vpop.xlane.xlu0 %760 }
 0x19b   :  { %v886_v16 = vsel %vm872_vm1, %v759_v13, 0.0  ;;  %v888_v17 = vsel %vm872_vm1, %v761_v15, 0.0 }
 0x19c   :  { %v887_v18 = vadd.f32 %v886_v16, %v885_v10 }
 0x19e   :  { %v889_v19 = vadd.f32 %v888_v17, %v887_v18  ;;  %v763_v23 = vpop.xlane.xlu1 %762  ;;  %v765_v24 = vpop.xlane.xlu0 %764 }
 0x19f   :  { %v890_v28 = vsel %vm872_vm1, %v763_v23, 0.0  ;;  %v892_v30 = vsel %vm872_vm1, %v765_v24, 0.0 }
 0x1a0   :  { %v891_v31 = vadd.f32 %v890_v28, %v889_v19 }
 0x1a2   :  { %v893_v32 = vadd.f32 %v892_v30, %v891_v31  ;;  %v767_v22 = vpop.xlane.xlu1 %766  ;;  %v769_v33 = vpop.xlane.xlu0 %768 }
 0x1a3   :  { %v894_v29 = vsel %vm872_vm1, %v767_v22, 0.0  ;;  %v896_v36 = vsel %vm872_vm1, %v769_v33, 0.0 }
 0x1a4   :  { %v895_v38 = vadd.f32 %v894_v29, %v893_v32 }
 0x1a6   :  { %v897_v26 = vadd.f32 %v896_v36, %v895_v38  ;;  %v771_v48 = vpop.xlane.xlu1 %770  ;;  %v773_v35 = vpop.xlane.xlu0 %772 }
 0x1a7   :  { %v898_v58 = vsel %vm872_vm1, %v771_v48, 0.0  ;;  %v900_v45 = vsel %vm872_vm1, %v773_v35, 0.0 }
 0x1a8   :  { %v899_v4 = vadd.f32 %v898_v58, %v897_v26 }
 0x1aa   :  { %v901_v55 = vadd.f32 %v900_v45, %v899_v4  ;;  %v775_v14 = vpop.xlane.xlu1 %774  ;;  %v777_v1 = vpop.xlane.xlu0 %776 }
 0x1ab   :  { %v902_v25 = vsel %vm872_vm1, %v775_v14, 0.0  ;;  %v904_v11 = vsel %vm872_vm1, %v777_v1, 0.0 }
 0x1ac   :  { %v903_v39 = vadd.f32 %v902_v25, %v901_v55 }
 0x1ae   :  { %v905_v40 = vadd.f32 %v904_v11, %v903_v39  ;;  %v779_v21 = vpop.xlane.xlu1 %778  ;;  %v781_v51 = vpop.xlane.xlu0 %780 }
 0x1af   :  { %v906_v34 = vsel %vm872_vm1, %v779_v21, 0.0  ;;  %v908_v63 = vsel %vm872_vm1, %v781_v51, 0.0 }
 0x1b0   :  { %v907_v47 = vadd.f32 %v906_v34, %v905_v40 }
 0x1b2   :  { %v909_v41 = vadd.f32 %v908_v63, %v907_v47  ;;  %v783_v12 = vpop.xlane.xlu1 %782  ;;  %v785_v60 = vpop.xlane.xlu0 %784 }
 0x1b3   :  { %v910_v27 = vsel %vm872_vm1, %v783_v12, 0.0  ;;  %v912_v8 = vsel %vm872_vm1, %v785_v60, 0.0 }
 0x1b4   :  { %v911_v43 = vadd.f32 %v910_v27, %v909_v41 }
 0x1b6   :  { %v913_v42 = vadd.f32 %v912_v8, %v911_v43  ;;  %v787_v20 = vpop.xlane.xlu1 %786  ;;  %v789_v37 = vpop.xlane.xlu0 %788 }
 0x1b7   :  { %v914_v44 = vsel %vm872_vm1, %v787_v20, 0.0  ;;  %v916_v46 = vsel %vm872_vm1, %v789_v37, 0.0 }
 0x1b8   :  { %v915_v49 = vadd.f32 %v914_v44, %v913_v42 }
 0x1ba   :  { %v917_v50 = vadd.f32 %v916_v46, %v915_v49  ;;  %v791_v52 = vpop.xlane.xlu1 %790  ;;  %v793_v53 = vpop.xlane.xlu0 %792 }
 0x1bb   :  { %v918_v54 = vsel %vm872_vm1, %v791_v52, 0.0  ;;  %v920_v56 = vsel %vm872_vm1, %v793_v53, 0.0 }
 0x1bc   :  { %v919_v57 = vadd.f32 %v918_v54, %v917_v50 }
 0x1be   :  { %v921_v59 = vadd.f32 %v920_v56, %v919_v57  ;;  %v795_v61 = vpop.xlane.xlu1 %794  ;;  %v797_v62 = vpop.xlane.xlu0 %796 }
 0x1bf   :  { %v922_v0 = vsel %vm872_vm1, %v795_v61, 0.0  ;;  %v924_v2 = vsel %vm872_vm1, %v797_v62, 0.0 }
 0x1c0   :  { %v923_v3 = vadd.f32 %v922_v0, %v921_v59 }
 0x1c2   :  { %v925_v5 = vadd.f32 %v924_v2, %v923_v3  ;;  %v799_v6 = vpop.xlane.xlu1 %798  ;;  %v801_v7 = vpop.xlane.xlu0 %800 }
 0x1c3   :  { %v926_v9 = vsel %vm872_vm1, %v799_v6, 0.0  ;;  %v928_v10 = vsel %vm872_vm1, %v801_v7, 0.0 }
 0x1c4   :  { %v927_v13 = vadd.f32 %v926_v9, %v925_v5 }
 0x1c6   :  { %v929_v15 = vadd.f32 %v928_v10, %v927_v13  ;;  %v803_v16 = vpop.xlane.xlu1 %802  ;;  %v805_v17 = vpop.xlane.xlu0 %804 }
 0x1c7   :  { %v930_v18 = vsel %vm872_vm1, %v803_v16, 0.0  ;;  %v932_v19 = vsel %vm872_vm1, %v805_v17, 0.0 }
 0x1c8   :  { %v931_v23 = vadd.f32 %v930_v18, %v929_v15 }
 0x1ca   :  { %v933_v24 = vadd.f32 %v932_v19, %v931_v23  ;;  %v807_v28 = vpop.xlane.xlu1 %806  ;;  %v809_v30 = vpop.xlane.xlu0 %808 }
 0x1cb   :  { %v934_v31 = vsel %vm872_vm1, %v807_v28, 0.0  ;;  %v936_v22 = vsel %vm872_vm1, %v809_v30, 0.0 }
 0x1cc   :  { %v935_v32 = vadd.f32 %v934_v31, %v933_v24 }
 0x1ce   :  { %v937_v33 = vadd.f32 %v936_v22, %v935_v32  ;;  %v811_v29 = vpop.xlane.xlu1 %810  ;;  %v813_v36 = vpop.xlane.xlu0 %812 }
 0x1cf   :  { %v938_v38 = vsel %vm872_vm1, %v811_v29, 0.0  ;;  %v940_v48 = vsel %vm872_vm1, %v813_v36, 0.0 }
 0x1d0   :  { %v939_v26 = vadd.f32 %v938_v38, %v937_v33 }
 0x1d2   :  { %v941_v35 = vadd.f32 %v940_v48, %v939_v26  ;;  %v815_v58 = vpop.xlane.xlu1 %814  ;;  %v817_v45 = vpop.xlane.xlu0 %816 }
 0x1d3   :  { %v942_v4 = vsel %vm872_vm1, %v815_v58, 0.0  ;;  %v944_v14 = vsel %vm872_vm1, %v817_v45, 0.0 }
 0x1d4   :  { %v943_v55 = vadd.f32 %v942_v4, %v941_v35 }
 0x1d6   :  { %v945_v1 = vadd.f32 %v944_v14, %v943_v55  ;;  %v819_v25 = vpop.xlane.xlu1 %818  ;;  %v821_v11 = vpop.xlane.xlu0 %820 }
 0x1d7   :  { %v946_v39 = vsel %vm872_vm1, %v819_v25, 0.0  ;;  %v948_v21 = vsel %vm872_vm1, %v821_v11, 0.0 }
 0x1d8   :  { %v947_v40 = vadd.f32 %v946_v39, %v945_v1 }
 0x1da   :  { %v949_v51 = vadd.f32 %v948_v21, %v947_v40  ;;  %v823_v34 = vpop.xlane.xlu1 %822  ;;  %v825_v63 = vpop.xlane.xlu0 %824 }
 0x1db   :  { %v950_v47 = vsel %vm872_vm1, %v823_v34, 0.0  ;;  %v952_v12 = vsel %vm872_vm1, %v825_v63, 0.0 }
 0x1dc   :  { %v951_v41 = vadd.f32 %v950_v47, %v949_v51 }
 0x1de   :  { %v953_v60 = vadd.f32 %v952_v12, %v951_v41  ;;  %v827_v27 = vpop.xlane.xlu1 %826  ;;  %v829_v8 = vpop.xlane.xlu0 %828 }
 0x1df   :  { %v954_v43 = vsel %vm872_vm1, %v827_v27, 0.0  ;;  %v956_v20 = vsel %vm872_vm1, %v829_v8, 0.0 }
 0x1e0   :  { %v955_v42 = vadd.f32 %v954_v43, %v953_v60 }
 0x1e2   :  { %v957_v37 = vadd.f32 %v956_v20, %v955_v42  ;;  %v831_v44 = vpop.xlane.xlu1 %830  ;;  %v833_v46 = vpop.xlane.xlu0 %832 }
 0x1e3   :  { %v958_v49 = vsel %vm872_vm1, %v831_v44, 0.0  ;;  %v960_v52 = vsel %vm872_vm1, %v833_v46, 0.0 }
 0x1e4   :  { %v959_v50 = vadd.f32 %v958_v49, %v957_v37 }
 0x1e6   :  { %v961_v53 = vadd.f32 %v960_v52, %v959_v50  ;;  %v835_v54 = vpop.xlane.xlu1 %834  ;;  %v837_v56 = vpop.xlane.xlu0 %836 }
 0x1e7   :  { %v962_v57 = vsel %vm872_vm1, %v835_v54, 0.0  ;;  %v964_v61 = vsel %vm872_vm1, %v837_v56, 0.0 }
 0x1e8   :  { %v963_v59 = vadd.f32 %v962_v57, %v961_v53 }
 0x1ea   :  { %v965_v62 = vadd.f32 %v964_v61, %v963_v59  ;;  %v839_v0 = vpop.xlane.xlu1 %838  ;;  %v841_v2 = vpop.xlane.xlu0 %840 }
 0x1eb   :  { %v966_v3 = vsel %vm872_vm1, %v839_v0, 0.0  ;;  %v968_v6 = vsel %vm872_vm1, %v841_v2, 0.0 }
 0x1ec   :  { %v967_v5 = vadd.f32 %v966_v3, %v965_v62 }
 0x1ee   :  { %v969_v7 = vadd.f32 %v968_v6, %v967_v5  ;;  %v843_v9 = vpop.xlane.xlu1 %842  ;;  %v845_v10 = vpop.xlane.xlu0 %844 }
 0x1ef   :  { %v970_v13 = vsel %vm872_vm1, %v843_v9, 0.0  ;;  %v972_v16 = vsel %vm872_vm1, %v845_v10, 0.0 }
 0x1f0   :  { %v971_v15 = vadd.f32 %v970_v13, %v969_v7 }
 0x1f2   :  { %v973_v17 = vadd.f32 %v972_v16, %v971_v15  ;;  %v847_v18 = vpop.xlane.xlu1 %846  ;;  %v849_v19 = vpop.xlane.xlu0 %848 }
 0x1f3   :  { %v974_v23 = vsel %vm872_vm1, %v847_v18, 0.0  ;;  %v976_v28 = vsel %vm872_vm1, %v849_v19, 0.0 }
 0x1f4   :  { %v975_v24 = vadd.f32 %v974_v23, %v973_v17 }
 0x1f6   :  { %v977_v30 = vadd.f32 %v976_v28, %v975_v24  ;;  %v851_v31 = vpop.xlane.xlu1 %850  ;;  %v853_v32 = vpop.xlane.xlu0 %852 }
 0x1f7   :  { %v978_v22 = vsel %vm872_vm1, %v851_v31, 0.0  ;;  %v980_v29 = vsel %vm872_vm1, %v853_v32, 0.0 }
 0x1f8   :  { %v979_v33 = vadd.f32 %v978_v22, %v977_v30 }
 0x1fa   :  { %v981_v36 = vadd.f32 %v980_v29, %v979_v33  ;;  %v855_v38 = vpop.xlane.xlu1 %854  ;;  %v857_v26 = vpop.xlane.xlu0 %856 }
 0x1fb   :  { %v982_v48 = vsel %vm872_vm1, %v855_v38, 0.0  ;;  %v984_v58 = vsel %vm872_vm1, %v857_v26, 0.0 }
 0x1fc   :  { %v983_v35 = vadd.f32 %v982_v48, %v981_v36 }
 0x1fe   :  { %v985_v45 = vadd.f32 %v984_v58, %v983_v35  ;;  %v859_v4 = vpop.xlane.xlu1 %858  ;;  %v861_v55 = vpop.xlane.xlu0 %860 }
 0x1ff   :  { %v986_v14 = vsel %vm872_vm1, %v859_v4, 0.0  ;;  %v988_v25 = vsel %vm872_vm1, %v861_v55, 0.0 }
 0x200   :  { %v987_v1 = vadd.f32 %v986_v14, %v985_v45 }
 0x202   :  { %v989_v11 = vadd.f32 %v988_v25, %v987_v1  ;;  %v863_v39 = vpop.xlane.xlu1 %862  ;;  %v865_v40 = vpop.xlane.xlu0 %864 }
 0x203   :  { %v990_v21 = vsel %vm872_vm1, %v863_v39, 0.0  ;;  %v992_v51 = vsel %vm872_vm1, %v865_v40, 0.0 }
 0x204   :  { %v991_v34 = vadd.f32 %v990_v21, %v989_v11 }
 0x206   :  { %v993_v63 = vadd.f32 %v992_v51, %v991_v34  ;;  %v867_v47 = vpop.xlane.xlu1 %866  ;;  %v869_v41 = vpop.xlane.xlu0 %868 }
 0x207   :  { %v994_v12 = vsel %vm872_vm1, %v867_v47, 0.0  ;;  %v996_v60 = vsel %vm872_vm1, %v869_v41, 0.0 }
 0x208   :  { %v995_v27 = vadd.f32 %v994_v12, %v993_v63 }
 0x20a   :  { %v997_v8 = vadd.f32 %v996_v60, %v995_v27  ;;  %v871_v43 = vpop.xlane.xlu1 %870 }
 0x20b   :  { %v998_v42 = vsel %vm872_vm1, %v871_v43, 0.0  ;;  %v1234_v37 = vpop.f32.mrb[30].mxu1 }
 0x20c   :  { %v999_v20 = vadd.f32 %v998_v42, %v997_v8  ;;  %v478_v44 = vpop.f32.mrb[31].mxu1 }
 0x20e   :  { %1000 = vadd.xlane.f32.xlu0 %v999_v20 }
 0x29b   :  { %v1001_v46 = vpop.xlane.xlu0 %1000 }
 0x29c   :  { %v1002_v49 = vrot.slane %v1001_v46, 4 }
 0x29e   :  { %v1003_v50 = vadd.f32 %v1002_v49, %v1001_v46 }
 0x2a0   :  { %v1004_v52 = vrot.slane %v1003_v50, 2 }
 0x2a2   :  { %v1005_v53 = vadd.f32 %v1004_v52, %v1003_v50 }
 0x2a4   :  { %v1006_v54 = vrot.slane %v1005_v53, 1 }
 0x2a6   :  { %v1007_v56 = vadd.f32 %v1006_v54, %v1005_v53 }
 0x2a8   :  { %1283 = vpush %v1007_v56 }
 0x2d9   :  { %s1284_s0 = spop %1283 }
 0x2da   :  { %s1009_s7 = smax.f32 %s1302_s6, %s1284_s0 }
 0x2db   :  { %s1010_s9 = smin.f32 %s1303_s8, %s1009_s7 }
 0x2dc   :  { %1012 = sst [smem:[#allocation2]] %s1010_s9 }
 0x2dd   :  { %1298 = shalt.err (!%p1295_p2)
}
 0x2de   :  { %s1304_s17 = smov [#allocation2]  }
 0x2df   :  { %1020 = dma.smem_to_hbm %s1304_s17, 16, %s1797_s3, [#allocation3]  }
 0x2e0   :  { %1299 = dma.done.wait [#allocation3], 16  }
 0x2e1   :  { %1300 = vsyncadd [#allocation3], 4294967280 }
 0x2e2   :  { %1024 = sfence }
 0x2e3   :  { %1025 = vsyncpa [#allocation3], 1 }

</bundles_post_ra>
